<compile_context>
chip_gen: v5e
topology: v5e:2x2
jax: 0.10.0
libtpu: 0.0.40
codegen_flags: <defaults>
</compile_context>

<pallas_src>
import functools

import jax
import jax.numpy as jnp
import numpy as np
from jax import lax
from jax.experimental import pallas as pl
from jax.experimental.pallas import tpu as pltpu

SMOOTH = 1e-12


def _round_up(x, m):
    return -(-x // m) * m


def _vmem_capacity_bytes():
    """Physical VMEM per TensorCore; conservative 64 MiB (v7x) fallback."""
    try:
        cap = int(pltpu.get_tpu_info().vmem_capacity_bytes)
        if cap >= (48 << 20):
            return cap
    except Exception:
        pass
    return 64 << 20


def _even_split_tile_d(d, grid_k):
    """Try a 128-multiple tile_d giving an EVEN feature-tile count, so the
    feature axis can be split exactly in two (zero waste) for the 2nd core."""
    for gk in (grid_k + 1, grid_k + 3):
        td = _round_up(pl.cdiv(d, gk), 128)
        if td >= 128 and pl.cdiv(d, td) % 2 == 0:
            return td
    return None


def _soft_dice_kernel(p_ref, t_ref, inter_ref, denom_ref, *,
                      d, tile_d, kps, full_tiles, need_mask):
    """Accumulate per-row intersection and sum(p)+sum(t) over feature tiles.

    Grid: (feature_shard, batch_tile, feature_tile). Accumulators are resident
    across the trailing "arbitrary" feature axis.  Rows past the true batch
    size exist only in discarded tail rows of the (partial) output block, so
    whatever padding a partial input block contains never reaches the result
    (all math here is row-wise independent).
    """
    k = pl.program_id(2)

    @pl.when(k == 0)
    def _():
        inter_ref[...] = jnp.zeros_like(inter_ref)
        denom_ref[...] = jnp.zeros_like(denom_ref)

    def _accumulate(p, t):
        inter_ref[...] += jnp.sum(p * t, axis=-1, keepdims=True)[None]
        denom_ref[...] += jnp.sum(p + t, axis=-1, keepdims=True)[None]

    if not need_mask:
        _accumulate(p_ref[...].astype(jnp.float32),
                    t_ref[...].astype(jnp.float32))
    else:
        s = pl.program_id(0)
        g = s * kps + k  # global feature-tile index

        @pl.when(g < full_tiles)           # interior tiles: unmasked fast path
        def _():
            _accumulate(p_ref[...].astype(jnp.float32),
                        t_ref[...].astype(jnp.float32))

        @pl.when(g >= full_tiles)          # only the last (partial) tile pays
        def _():
            p = p_ref[...].astype(jnp.float32)
            t = t_ref[...].astype(jnp.float32)
            col = g * tile_d + lax.broadcasted_iota(jnp.int32, p.shape, 1)
            valid = col < d
            p = jnp.where(valid, p, 0.0)   # select (not multiply) so OOB
            t = jnp.where(valid, t, 0.0)   # garbage/NaN never contaminates
            _accumulate(p, t)


def soft_dice_loss(probs, targets, *, tile_n=None, tile_d=None):
    """Pallas SoftDiceLoss. probs, targets: (N, D) arrays (any float dtype)."""
    assert probs.shape == targets.shape and probs.ndim == 2
    n, d = probs.shape
    itemsize = max(probs.dtype.itemsize, targets.dtype.itemsize)
    sublane = max(8, 32 // itemsize)            # 8 f32 / 16 bf16 / 32 int8

    vmem_cap = _vmem_capacity_bytes()
    # Largest per-input block such that 2 inputs x 2 pipeline buffers plus
    # headroom fit: ~10 MiB on v7x (64 MiB VMEM), ~12 MiB on v5e/v6e (128 MiB).
    block_bytes_target = min(12 << 20, max(4 << 20, (vmem_cap - (24 << 20)) // 4))
    target_elems = max(8 * 128, block_bytes_target // itemsize)

    n_pad = _round_up(n, sublane)
    d128 = _round_up(d, 128)

    auto_tile_d = tile_d is None
    if tile_n is None:
        tile_n = min(n_pad,
                     max(sublane, _round_up(max(1, target_elems // d128), sublane)))
    if tile_d is None:
        td_max = max(128, (target_elems // tile_n) // 128 * 128)
        tile_d = d if d <= td_max else td_max

    grid_n = pl.cdiv(n, tile_n)
    grid_k = pl.cdiv(d, tile_d)

    # Guarantee a leading "parallel" axis of extent >= 2 (v7x dual TensorCore)
    # when the batch axis has a single tile, by splitting the feature axis
    # into two exactly equal halves.  Only zero-waste splits are taken, so
    # single-core chips never pay extra HBM traffic.
    n_shards = 1
    if grid_n == 1:
        if grid_k % 2 == 1 and auto_tile_d and d >= 2048:
            new_td = _even_split_tile_d(d, grid_k)
            if new_td is not None:
                tile_d = new_td
                grid_k = pl.cdiv(d, tile_d)
        if grid_k >= 2 and grid_k % 2 == 0:
            n_shards = 2
    kps = grid_k // n_shards

    full_tiles = d // tile_d
    need_mask = (d % tile_d) != 0

    # Scoped-VMEM limit derived from the actual double-buffered footprint
    # (+8 MiB headroom for Mosaic scratch), never closer than 8 MiB to the
    # physical capacity.
    block_bytes = tile_n * tile_d * itemsize
    vmem_limit = 2 * 2 * block_bytes + 2 * 2 * tile_n * 4 * 2 + (8 << 20)
    vmem_limit = int(max(32 << 20, min(vmem_limit, vmem_cap - (8 << 20), 96 << 20)))

    kernel = functools.partial(
        _soft_dice_kernel, d=d, tile_d=tile_d, kps=kps,
        full_tiles=full_tiles, need_mask=need_mask)

    in_bytes = n * d * (probs.dtype.itemsize + targets.dtype.itemsize)
    cost = pl.CostEstimate(flops=4 * n * d, transcendentals=0,
                           bytes_accessed=in_bytes + 2 * n_shards * n * 4)

    inter, denom = pl.pallas_call(
        kernel,
        out_shape=(
            jax.ShapeDtypeStruct((n_shards, n, 1), jnp.float32),  # intersection
            jax.ShapeDtypeStruct((n_shards, n, 1), jnp.float32),  # sum(p)+sum(t)
        ),
        grid_spec=pltpu.PrefetchScalarGridSpec(
            num_scalar_prefetch=0,
            grid=(n_shards, grid_n, kps),
            in_specs=[
                pl.BlockSpec((tile_n, tile_d), lambda s, i, k: (i, s * kps + k)),
                pl.BlockSpec((tile_n, tile_d), lambda s, i, k: (i, s * kps + k)),
            ],
            out_specs=[
                pl.BlockSpec((1, tile_n, 1), lambda s, i, k: (s, i, 0)),
                pl.BlockSpec((1, tile_n, 1), lambda s, i, k: (s, i, 0)),
            ],
        ),
        compiler_params=pltpu.CompilerParams(
            dimension_semantics=("parallel", "parallel", "arbitrary"),
            vmem_limit_bytes=vmem_limit,
        ),
        cost_estimate=cost,
    )(probs, targets)

    # Tiny scalar epilogue in plain JAX (negligible vs. the streaming kernel).
    inter = jnp.sum(inter[:, :, 0], axis=0)   # (n,)
    denom = jnp.sum(denom[:, :, 0], axis=0)
    # NOTE: SMOOTH=1e-12 added in f32 vanishes for O(1)+ denominators; this
    # matches the PyTorch fp32 reference exactly (intentional).
    score = 2.0 * inter / (denom + SMOOTH)
    return 1.0 - jnp.sum(score) / n


def soft_dice_loss_ref(probs, targets):
    num = targets.shape[0]
    p = probs.astype(jnp.float32)
    t = targets.astype(jnp.float32)
    inter = jnp.sum(p * t, axis=1)
    score = 2.0 * inter / (jnp.sum(p, axis=1) + jnp.sum(t, axis=1) + SMOOTH)
    return 1.0 - jnp.sum(score) / num


if __name__ == "__main__":
    key = jax.random.PRNGKey(0)
    k1, k2 = jax.random.split(key)

    # 1) batch=2, D = 4*16*16 = 1024 (per-sample features flattened, as the
    #    dice loss's .sum(1) implies), f32.
    N, D = 2, 4 * 16 * 16
    probs = jax.nn.sigmoid(jax.random.normal(k1, (N, D), dtype=jnp.float32))
    targets = (jax.random.uniform(k2, (N, D)) > 0.5).astype(jnp.float32)
    loss = jax.block_until_ready(soft_dice_loss(probs, targets))
    ref = soft_dice_loss_ref(probs, targets)
    assert np.allclose(np.asarray(loss), np.asarray(ref),
                       rtol=1e-5, atol=1e-6), (loss, ref)

    # 2) Unaligned shapes with explicit tiles: exercises the 2-shard parallel
    #    split (grid_k=2), the batch-tail partial rows, and the lane mask.
    N2, D2 = 3, 200
    p2 = jax.nn.sigmoid(jax.random.normal(k1, (N2, D2), dtype=jnp.float32))
    t2 = (jax.random.uniform(k2, (N2, D2)) > 0.5).astype(jnp.float32)
    loss2 = jax.block_until_ready(soft_dice_loss(p2, t2, tile_n=8, tile_d=128))
    ref2 = soft_dice_loss_ref(p2, t2)
    assert np.allclose(np.asarray(loss2), np.asarray(ref2),
                       rtol=1e-5, atol=1e-6), (loss2, ref2)

    # 3) bf16 inputs stay bf16 in HBM (half the bytes); accumulation is f32.
    pb = probs.astype(jnp.bfloat16)
    tb = targets.astype(jnp.bfloat16)
    loss3 = jax.block_until_ready(soft_dice_loss(pb, tb))
    ref3 = soft_dice_loss_ref(pb, tb)
    assert np.allclose(np.asarray(loss3), np.asarray(ref3),
                       rtol=1e-3, atol=1e-3), (loss3, ref3)

    # 4) Multiple k-tiles per shard + final-tile mask + batch-tail rows.
    N4, D4 = 5, 1000
    p4 = jax.nn.sigmoid(jax.random.normal(k1, (N4, D4), dtype=jnp.float32))
    t4 = (jax.random.uniform(k2, (N4, D4)) > 0.5).astype(jnp.float32)
    loss4 = jax.block_until_ready(soft_dice_loss(p4, t4, tile_n=8, tile_d=128))
    ref4 = soft_dice_loss_ref(p4, t4)
    assert np.allclose(np.asarray(loss4), np.asarray(ref4),
                       rtol=1e-5, atol=1e-6), (loss4, ref4)

    # 5) Auto tiling path that triggers the even feature split (grid_k 1 -> 2).
    N5, D5 = 20, 4096
    p5 = jax.nn.sigmoid(jax.random.normal(k1, (N5, D5), dtype=jnp.float32))
    t5 = (jax.random.uniform(k2, (N5, D5)) > 0.5).astype(jnp.float32)
    loss5 = jax.block_until_ready(soft_dice_loss(p5, t5))
    ref5 = soft_dice_loss_ref(p5, t5)
    assert np.allclose(np.asarray(loss5), np.asarray(ref5),
                       rtol=1e-5, atol=1e-6), (loss5, ref5)

    print("KERNEL_OK")
</pallas_src>

<mosaic_0001>
module attributes {stable_mosaic.version = 11 : i64} {
  func.func @_soft_dice_kernel(%arg0: i32, %arg1: i32, %arg2: i32, %arg3: memref<8x1024xf32, #tpu.memory_space<vmem>>, %arg4: memref<8x1024xf32, #tpu.memory_space<vmem>>, %arg5: memref<1x8x1xf32, #tpu.memory_space<vmem>>, %arg6: memref<1x8x1xf32, #tpu.memory_space<vmem>>) attributes {dimension_semantics = [#tpu.dimension_semantics<parallel>, #tpu.dimension_semantics<parallel>, #tpu.dimension_semantics<arbitrary>], iteration_bounds = array<i64: 1, 1, 1>, scalar_prefetch = 0 : i64, scratch_operands = 0 : i64, tpu.core_type = #tpu.core_type<tc>, window_params = [{transform_indices = @transform_0, window_bounds = array<i64: 8, 1024>}, {transform_indices = @transform_1, window_bounds = array<i64: 8, 1024>}, {transform_indices = @transform_2, window_bounds = array<i64: 1, 8, 1>}, {transform_indices = @transform_3, window_bounds = array<i64: 1, 8, 1>}]} {
    %c0_i32 = arith.constant 0 : i32
    %0 = arith.cmpi eq, %arg2, %c0_i32 : i32
    %1 = arith.extui %0 : i1 to i32
    %c0_i32_0 = arith.constant 0 : i32
    %2 = arith.cmpi ne, %1, %c0_i32_0 : i32
    scf.if %2 {
      %cst_17 = arith.constant 0.000000e+00 : f32
      %19 = vector.broadcast %cst_17 : f32 to vector<1x8x1xf32>
      %c0_18 = arith.constant 0 : index
      %c0_19 = arith.constant 0 : index
      %c0_20 = arith.constant 0 : index
      %20 = vector.load %arg5[%c0_18, %c0_19, %c0_20] : memref<1x8x1xf32, #tpu.memory_space<vmem>>, vector<1x8x1xf32>
      tpu.vector_store %arg5[%c0_18, %c0_19, %c0_20], %19 {strides = array<i32>} : memref<1x8x1xf32, #tpu.memory_space<vmem>>, vector<1x8x1xf32>,
      %cst_21 = arith.constant 0.000000e+00 : f32
      %21 = vector.broadcast %cst_21 : f32 to vector<1x8x1xf32>
      %c0_22 = arith.constant 0 : index
      %c0_23 = arith.constant 0 : index
      %c0_24 = arith.constant 0 : index
      %22 = vector.load %arg6[%c0_22, %c0_23, %c0_24] : memref<1x8x1xf32, #tpu.memory_space<vmem>>, vector<1x8x1xf32>
      tpu.vector_store %arg6[%c0_22, %c0_23, %c0_24], %21 {strides = array<i32>} : memref<1x8x1xf32, #tpu.memory_space<vmem>>, vector<1x8x1xf32>,
    } else {
    }
    %c0 = arith.constant 0 : index
    %c0_1 = arith.constant 0 : index
    %3 = vector.load %arg3[%c0, %c0_1] : memref<8x1024xf32, #tpu.memory_space<vmem>>, vector<8x1024xf32>
    %c0_2 = arith.constant 0 : index
    %c0_3 = arith.constant 0 : index
    %4 = vector.load %arg4[%c0_2, %c0_3] : memref<8x1024xf32, #tpu.memory_space<vmem>>, vector<8x1024xf32>
    %c0_4 = arith.constant 0 : index
    %c0_5 = arith.constant 0 : index
    %c0_6 = arith.constant 0 : index
    %5 = vector.load %arg5[%c0_4, %c0_5, %c0_6] : memref<1x8x1xf32, #tpu.memory_space<vmem>>, vector<1x8x1xf32>
    %6 = arith.mulf %3, %4 : vector<8x1024xf32>
    %cst = arith.constant dense<0.000000e+00> : vector<8xf32>
    %7 = vector.multi_reduction <add>, %6, %cst [1] : vector<8x1024xf32> to vector<8xf32>
    %8 = vector.shape_cast %7 : vector<8xf32> to vector<8x1xf32>
    %9 = vector.shape_cast %8 : vector<8x1xf32> to vector<1x8x1xf32>
    %10 = arith.addf %5, %9 : vector<1x8x1xf32>
    %c0_7 = arith.constant 0 : index
    %c0_8 = arith.constant 0 : index
    %c0_9 = arith.constant 0 : index
    %11 = vector.load %arg5[%c0_7, %c0_8, %c0_9] : memref<1x8x1xf32, #tpu.memory_space<vmem>>, vector<1x8x1xf32>
    tpu.vector_store %arg5[%c0_7, %c0_8, %c0_9], %10 {strides = array<i32>} : memref<1x8x1xf32, #tpu.memory_space<vmem>>, vector<1x8x1xf32>,
    %c0_10 = arith.constant 0 : index
    %c0_11 = arith.constant 0 : index
    %c0_12 = arith.constant 0 : index
    %12 = vector.load %arg6[%c0_10, %c0_11, %c0_12] : memref<1x8x1xf32, #tpu.memory_space<vmem>>, vector<1x8x1xf32>
    %13 = arith.addf %3, %4 : vector<8x1024xf32>
    %cst_13 = arith.constant dense<0.000000e+00> : vector<8xf32>
    %14 = vector.multi_reduction <add>, %13, %cst_13 [1] : vector<8x1024xf32> to vector<8xf32>
    %15 = vector.shape_cast %14 : vector<8xf32> to vector<8x1xf32>
    %16 = vector.shape_cast %15 : vector<8x1xf32> to vector<1x8x1xf32>
    %17 = arith.addf %12, %16 : vector<1x8x1xf32>
    %c0_14 = arith.constant 0 : index
    %c0_15 = arith.constant 0 : index
    %c0_16 = arith.constant 0 : index
    %18 = vector.load %arg6[%c0_14, %c0_15, %c0_16] : memref<1x8x1xf32, #tpu.memory_space<vmem>>, vector<1x8x1xf32>
    tpu.vector_store %arg6[%c0_14, %c0_15, %c0_16], %17 {strides = array<i32>} : memref<1x8x1xf32, #tpu.memory_space<vmem>>, vector<1x8x1xf32>,
    return
  }
  func.func @transform_0(%arg0: i32, %arg1: i32, %arg2: i32) -> (i32, i32) {
    %c1_i32 = arith.constant 1 : i32
    %0 = arith.muli %arg0, %c1_i32 : i32
    %1 = arith.addi %0, %arg2 : i32
    %c0_i32 = arith.constant 0 : i32
    return %arg1, %1 : i32, i32
  }
  func.func @transform_1(%arg0: i32, %arg1: i32, %arg2: i32) -> (i32, i32) {
    %c1_i32 = arith.constant 1 : i32
    %0 = arith.muli %arg0, %c1_i32 : i32
    %1 = arith.addi %0, %arg2 : i32
    %c0_i32 = arith.constant 0 : i32
    return %arg1, %1 : i32, i32
  }
  func.func @transform_2(%arg0: i32, %arg1: i32, %arg2: i32) -> (i32, i32, i32) {
    %c0_i32 = arith.constant 0 : i32
    %c0_i32_0 = arith.constant 0 : i32
    return %arg0, %arg1, %c0_i32 : i32, i32, i32
  }
  func.func @transform_3(%arg0: i32, %arg1: i32, %arg2: i32) -> (i32, i32, i32) {
    %c0_i32 = arith.constant 0 : i32
    %c0_i32_0 = arith.constant 0 : i32
    return %arg0, %arg1, %c0_i32 : i32, i32, i32
  }
}

</mosaic_0001>

<bundles_post_ra>
// kernel: tpu_custom_call.1
= control target key start
LH: loop header
LB: loop body
LE: loop exit
PB: predicated region body
PF: predicated region fallthrough
CT: control target
= control target key end

     0   :  { %9 = vsyncpa [#allocation3], 0  ;;  %s381_s0 = inlined_call_operand.hbm [shape: f32[2,1024], index: 0, kind: input, shape index: {}]   ;;  %s382_s1 = inlined_call_operand.hbm [shape: f32[2,1024], index: 1, kind: input, shape index: {}]   ;;  %s383_s2 = inlined_call_operand.vmem [shape: f32[1,2,1], index: 2, kind: output, shape index: {0}]   ;;  %s384_s3 = inlined_call_operand.vmem [shape: f32[1,2,1], index: 3, kind: output, shape index: {1}]  }
   0x1   :  { %10 = vsyncpa [#allocation5], 0 }
   0x2   :  { %16 = vsyncadd [#allocation3], 768  ;;  %s19_s14 = sshll.u32 %s381_s0, 4  ;;  %s340_s15 = smov [#allocation2]   ;;  %s20_s14 = int_to_ptr.hbm [resolvable:$true] %s19_s14 }
   0x3   :  { %s21_s16 = sshll.u32 %s340_s15, 4  ;;  %s341_s17 = smov 256   ;;  %s22_s16 = int_to_ptr.vmem [resolvable:$true] %s21_s16 }
   0x4   :  { %s342_s18 = smov 16  }
   0x5   :  { %27 = dma.hbm_to_vmem [thread:$0]  %s20_s14, 256, %s22_s16, [#allocation3], %s341_s17, %s341_s17, %s342_s18  }
   0x6   :  { %33 = vsyncadd [#allocation5], 768  ;;  %s36_s21 = sshll.u32 %s382_s1, 4  ;;  %s343_s22 = smov [#allocation4]   ;;  %s37_s21 = int_to_ptr.hbm [resolvable:$true] %s36_s21 }
   0x7   :  { %s38_s23 = sshll.u32 %s343_s22, 4  ;;  %s39_s23 = int_to_ptr.vmem [resolvable:$true] %s38_s23 }
   0x8   :  { %44 = dma.hbm_to_vmem [thread:$0]  %s37_s21, 256, %s39_s23, [#allocation5], %s341_s17, %s341_s17, %s342_s18  }
   0x9   :  { %336 = dma.done.wait [#allocation3], 1024  }
   0xa   :  { %337 = vsyncadd [#allocation3], 4294966272 }
   0xb   :  { %338 = dma.done.wait [#allocation5], 1024  }
   0xc   :  { %339 = vsyncadd [#allocation5], 4294966272  ;;  %v64_v0 = vld [vmem:[#allocation2] sm:$0xff]  ;;  %v65_v1 = vld [vmem:[#allocation2 + $0x8] sm:$0xff]  ;;  %vm61_vm0 = vcmask 7168   ;;  %v344_v25 = vmov 0.0  }
   0xd   :  { %v66_v2 = vld [vmem:[#allocation2 + $0x10] sm:$0xff]  ;;  %v67_v3 = vld [vmem:[#allocation2 + $0x18] sm:$0xff]  ;;  %v68_v4 = vld [vmem:[#allocation2 + $0x20] sm:$0xff]  ;;  %62 = vst.msk [vmem:[#allocation6] sm:$0xff] %vm61_vm0, %v344_v25 }
   0xe   :  { %v69_v5 = vld [vmem:[#allocation2 + $0x28] sm:$0xff]  ;;  %v70_v6 = vld [vmem:[#allocation2 + $0x30] sm:$0xff]  ;;  %v72_v7 = vld [vmem:[#allocation4] sm:$0xff]  ;;  %63 = vst.msk [vmem:[#allocation7] sm:$0xff] %vm61_vm0, %v344_v25 }
   0xf   :  { %v73_v8 = vld [vmem:[#allocation4 + $0x8] sm:$0xff]  ;;  %v74_v9 = vld [vmem:[#allocation4 + $0x10] sm:$0xff]  ;;  %v75_v10 = vld [vmem:[#allocation4 + $0x18] sm:$0xff]  ;;  %v81_v11 = vmul.f32 %v72_v7, %v64_v0  ;;  %v141_v24 = vadd.f32 %v72_v7, %v64_v0 }
  0x10   :  { %v76_v12 = vld [vmem:[#allocation4 + $0x20] sm:$0xff]  ;;  %v77_v13 = vld [vmem:[#allocation4 + $0x28] sm:$0xff]  ;;  %v78_v14 = vld [vmem:[#allocation4 + $0x30] sm:$0xff]  ;;  %v83_v15 = vmul.f32 %v74_v9, %v66_v2  ;;  %v82_v18 = vmul.f32 %v73_v8, %v65_v1  ;;  %v84_v21 = vmul.f32 %v75_v10, %v67_v3  ;;  %v143_v26 = vadd.f32 %v74_v9, %v66_v2 }
  0x11   :  { %v71_v16 = vld [vmem:[#allocation2 + $0x38] sm:$0xff]  ;;  %v85_v19 = vmul.f32 %v76_v12, %v68_v4  ;;  %v87_v20 = vmul.f32 %v78_v14, %v70_v6  ;;  %97 = vst [vmem:[#allocation1] ss:$4 sm:$0xff] %v81_v11  ;;  %v86_v22 = vmul.f32 %v77_v13, %v69_v5  ;;  %v145_v32 = vadd.f32 %v76_v12, %v68_v4 }
  0x12   :  { %v79_v17 = vld [vmem:[#allocation4 + $0x38] sm:$0xff]  ;;  %99 = vst [vmem:[#allocation1 + $0x1] ss:$4 sm:$0xff] %v83_v15  ;;  %v147_v34 = vadd.f32 %v78_v14, %v70_v6  ;;  %v142_v37 = vadd.f32 %v73_v8, %v65_v1  ;;  %v144_v41 = vadd.f32 %v75_v10, %v67_v3  ;;  %v146_v42 = vadd.f32 %v77_v13, %v69_v5 }
  0x13   :  { %101 = vst [vmem:[#allocation1 + $0x2] ss:$4 sm:$0xff] %v85_v19  ;;  %v88_v23 = vmul.f32 %v79_v17, %v71_v16  ;;  %v148_v44 = vadd.f32 %v79_v17, %v71_v16 }
  0x14   :  { %103 = vst [vmem:[#allocation1 + $0x3] ss:$4 sm:$0xff] %v87_v20  ;;  %v80_v63 = vld [vmem:[#allocation6] sm:$0xff] }
  0x15   :  { %105 = vst [vmem:[#allocation1 + $0x20] ss:$4 sm:$0xff] %v82_v18  ;;  %v140_v3 = vld [vmem:[#allocation7] sm:$0xff] }
  0x16   :  { %107 = vst [vmem:[#allocation1 + $0x21] ss:$4 sm:$0xff] %v84_v21 }
  0x17   :  { %109 = vst [vmem:[#allocation1 + $0x22] ss:$4 sm:$0xff] %v86_v22 }
  0x18   :  { %111 = vst [vmem:[#allocation1 + $0x23] ss:$4 sm:$0xff] %v88_v23 }
  0x1b   :  { %v112_v27 = vld.sshfl [vmem:[#allocation1] sm:$0xff pattern:$0x73625140]  ;;  %v113_v28 = vld.sshfl [vmem:[#allocation1 + $0x8] sm:$0xff pattern:$0x73625140] }
  0x1c   :  { %v114_v29 = vld.sshfl [vmem:[#allocation1 + $0x10] sm:$0xff pattern:$0x73625140]  ;;  %v115_v30 = vld.sshfl [vmem:[#allocation1 + $0x18] sm:$0xff pattern:$0x73625140]  ;;  %v128_v31 = vadd.f32 %v113_v28, %v112_v27 }
  0x1d   :  { %157 = vst [vmem:[#allocation1] ss:$4 sm:$0xff] %v141_v24 }
  0x1e   :  { %v129_v33 = vadd.f32 %v128_v31, %v114_v29  ;;  %159 = vst [vmem:[#allocation1 + $0x1] ss:$4 sm:$0xff] %v143_v26 }
  0x1f   :  { %v116_v35 = vld.sshfl [vmem:[#allocation1 + $0x20] sm:$0xff pattern:$0x73625140]  ;;  %v117_v36 = vld.sshfl [vmem:[#allocation1 + $0x28] sm:$0xff pattern:$0x73625140] }
  0x20   :  { %v118_v38 = vld.sshfl [vmem:[#allocation1 + $0x30] sm:$0xff pattern:$0x73625140]  ;;  %v119_v39 = vld.sshfl [vmem:[#allocation1 + $0x38] sm:$0xff pattern:$0x73625140]  ;;  %v130_v40 = vadd.f32 %v129_v33, %v115_v30 }
  0x21   :  { %161 = vst [vmem:[#allocation1 + $0x2] ss:$4 sm:$0xff] %v145_v32 }
  0x22   :  { %v131_v43 = vadd.f32 %v130_v40, %v116_v35  ;;  %163 = vst [vmem:[#allocation1 + $0x3] ss:$4 sm:$0xff] %v147_v34 }
  0x23   :  { %165 = vst [vmem:[#allocation1 + $0x20] ss:$4 sm:$0xff] %v142_v37 }
  0x24   :  { %v132_v45 = vadd.f32 %v131_v43, %v117_v36  ;;  %167 = vst [vmem:[#allocation1 + $0x21] ss:$4 sm:$0xff] %v144_v41 }
  0x25   :  { %169 = vst [vmem:[#allocation1 + $0x22] ss:$4 sm:$0xff] %v146_v42 }
  0x26   :  { %v133_v46 = vadd.f32 %v132_v45, %v118_v38  ;;  %171 = vst [vmem:[#allocation1 + $0x23] ss:$4 sm:$0xff] %v148_v44 }
  0x28   :  { %v134_v47 = vadd.f32 %v133_v46, %v119_v39 }
  0x29   :  { %v172_v48 = vld.sshfl [vmem:[#allocation1] sm:$0xff pattern:$0x73625140]  ;;  %v173_v49 = vld.sshfl [vmem:[#allocation1 + $0x8] sm:$0xff pattern:$0x73625140] }
  0x2a   :  { %135 = vadd.xlane.f32.xlu0 %v134_v47  ;;  %v174_v50 = vld.sshfl [vmem:[#allocation1 + $0x10] sm:$0xff pattern:$0x73625140]  ;;  %v188_v51 = vadd.f32 %v173_v49, %v172_v48  ;;  %v175_v52 = vld.sshfl [vmem:[#allocation1 + $0x18] sm:$0xff pattern:$0x73625140] }
  0x2c   :  { %v189_v53 = vadd.f32 %v188_v51, %v174_v50 }
  0x2d   :  { %v176_v54 = vld.sshfl [vmem:[#allocation1 + $0x20] sm:$0xff pattern:$0x73625140]  ;;  %v177_v56 = vld.sshfl [vmem:[#allocation1 + $0x28] sm:$0xff pattern:$0x73625140] }
  0x2e   :  { %v190_v55 = vadd.f32 %v189_v53, %v175_v52  ;;  %v178_v58 = vld.sshfl [vmem:[#allocation1 + $0x30] sm:$0xff pattern:$0x73625140]  ;;  %v179_v60 = vld.sshfl [vmem:[#allocation1 + $0x38] sm:$0xff pattern:$0x73625140] }
  0x30   :  { %v191_v57 = vadd.f32 %v190_v55, %v176_v54 }
  0x32   :  { %v192_v59 = vadd.f32 %v191_v57, %v177_v56 }
  0x34   :  { %v193_v61 = vadd.f32 %v192_v59, %v178_v58 }
  0x36   :  { %v194_v62 = vadd.f32 %v193_v61, %v179_v60 }
  0x38   :  { %195 = vadd.xlane.f32.xlu0 %v194_v62 }
  0x9d   :  { %v136_v0 = vpop.xlane.xlu0 %135 }
  0x9e   :  { %v137_v1 = vadd.f32 %v136_v0, %v80_v63 }
  0xa0   :  { %139 = vst.msk [vmem:[#allocation6] sm:$0xff] %vm61_vm0, %v137_v1 }
  0xa7   :  { %v217_v2 = vld [vmem:[#allocation6] sm:$0x3] }
  0xa8   :  { %218 = vst [vmem:[%s383_s2] sm:$0x3] %v217_v2 }
  0xab   :  { %v196_v4 = vpop.xlane.xlu0 %195 }
  0xac   :  { %v197_v5 = vadd.f32 %v196_v4, %v140_v3 }
  0xae   :  { %198 = vst.msk [vmem:[#allocation7] sm:$0xff] %vm61_vm0, %v197_v5 }
  0xb5   :  { %v252_v6 = vld [vmem:[#allocation7] sm:$0x3] }
  0xb6   :  { %253 = vst [vmem:[%s384_s3] sm:$0x3] %v252_v6 }
  0xb7   :  { %273 = vsyncpa [#allocation3], 1 }
  0xb8   :  { %274 = vsyncpa [#allocation5], 1 }

</bundles_post_ra>
